<compile_context>
chip_gen: v7x
topology: tpu7x:2x2x1
jax: 0.10.0
libtpu: 0.0.40
codegen_flags: <defaults>
</compile_context>

<pallas_src>
import math
from functools import partial

import jax
import jax.numpy as jnp
from jax import lax
from jax.experimental import pallas as pl
from jax.experimental.pallas import tpu as pltpu


# ---------------------------------------------------------------------------
# Kernels
# ---------------------------------------------------------------------------

def _kv_proj_kernel(enc_ref, wk_ref, wv_ref, k_ref, v_ref):
    """Per-batch K/V projections — computed once, NOT once per query tile."""
    enc = enc_ref[0]                                               # (Skv, Dc) bf16
    k_ref[0] = jnp.dot(enc, wk_ref[...],
                       preferred_element_type=jnp.float32).astype(k_ref.dtype)
    v_ref[0] = jnp.dot(enc, wv_ref[...],
                       preferred_element_type=jnp.float32).astype(v_ref.dtype)


def _cross_attn_kernel(hid_ref, k_ref, v_ref, wq_ref, wo_ref, bo_ref, out_ref,
                       *, heads, dim_head):
    hid = hid_ref[0]                                               # (tq, Dq) bf16
    tq = hid.shape[0]
    skv = k_ref.shape[1]
    inner = heads * dim_head

    # Q projection for all heads at once; attention scale is pre-folded into Wq.
    q = jnp.dot(hid, wq_ref[...], preferred_element_type=jnp.float32)  # (tq, inner)
    q = q.astype(jnp.bfloat16).reshape(tq, heads, dim_head)            # (tq, H, dh)

    k = k_ref[0].reshape(skv, heads, dim_head)                     # (Skv, H, dh) bf16
    v = v_ref[0].reshape(skv, heads, dim_head)                     # (Skv, H, dh) bf16

    # Head-batched scores (contract dh, batch H) -> (H, tq, Skv), f32 accumulate.
    s = jnp.einsum("qhd,khd->hqk", q, k, preferred_element_type=jnp.float32)

    # Softmax in f32 (v5e-safe); denominator via the EUP reciprocal slot.
    s = s - jnp.max(s, axis=-1, keepdims=True)
    p = jnp.exp(s)
    p = p * pl.reciprocal(jnp.sum(p, axis=-1, keepdims=True), approx=True)

    # Head-batched P @ V, produced directly as (tq, H, dh), then flatten heads.
    a = jnp.einsum("hqk,khd->qhd", p.astype(jnp.bfloat16), v,
                   preferred_element_type=jnp.float32)             # (tq, H, dh)
    attn = a.astype(jnp.bfloat16).reshape(tq, inner)               # (tq, inner)

    # Single full-width output projection (to_out[0]) + bias.
    out = jnp.dot(attn, wo_ref[...], preferred_element_type=jnp.float32)
    # TODO(synk): if Dq is ever not a multiple of 128, pad attn/Wo/out to the
    # next 128 multiple so the final store stays a lane-dense unmasked vst.
    out_ref[0] = (out + bo_ref[...]).astype(out_ref.dtype)


# ---------------------------------------------------------------------------
# Spec / budget helpers
# ---------------------------------------------------------------------------

def _weight_spec(shape, single_buffer):
    """Full-array, VMEM-resident operand (constant index_map over the grid)."""
    index_map = lambda *_: (0,) * len(shape)
    if single_buffer:
        try:
            # Constant-index operands never need a second pipeline buffer.
            return pl.BlockSpec(shape, index_map, pipeline_mode=pl.Buffered(1))
        except Exception:
            pass
    return pl.BlockSpec(shape, index_map)


def _vmem_capacity_bytes():
    try:
        return int(pltpu.get_tpu_info().vmem_capacity_bytes)
    except Exception:
        return 64 * 1024 * 1024        # conservative: v7x per-TensorCore VMEM


def _attn_vmem_estimate(tq, Dq, Skv, inner, heads):
    """Rough per-call VMEM bytes for the attention kernel (double-buffered I/O)."""
    bf16, f32 = 2, 4
    weights = (Dq * inner + inner * Dq + Dq) * bf16        # Wq, Wo (bias ~tiny)
    hid = 2 * tq * Dq * bf16                               # input tile, 2 buffers
    kv = 2 * 2 * Skv * inner * bf16                        # k and v, 2 buffers each
    out = 2 * tq * Dq * f32                                # output tile, 2 buffers
    q = tq * inner * (f32 + bf16)
    scores = heads * tq * Skv * (2 * f32 + bf16)           # s, p(f32), p(bf16)
    acc = tq * inner * (f32 + bf16)
    return weights + hid + kv + out + q + scores + acc


def _choose_block_q(Sq, Dq, Skv, inner, heads, capacity):
    budget = int(0.55 * capacity)      # headroom for Mosaic internal scratch
    for t in (1024, 512, 256, 128, 64, 32, 16, 8):
        if t <= Sq and Sq % t == 0 and \
                _attn_vmem_estimate(t, Dq, Skv, inner, heads) <= budget:
            return t
    return Sq                          # tiny / odd sequences: one tile covers all


# ---------------------------------------------------------------------------
# pallas_call builders
# ---------------------------------------------------------------------------

def _kv_projection(enc_bf16, wk, wv, *, vmem_limit, single_buffer):
    B, Skv, Dc = enc_bf16.shape
    inner = wk.shape[1]
    return pl.pallas_call(
        _kv_proj_kernel,
        out_shape=(jax.ShapeDtypeStruct((B, Skv, inner), jnp.bfloat16),
                   jax.ShapeDtypeStruct((B, Skv, inner), jnp.bfloat16)),
        grid_spec=pltpu.PrefetchScalarGridSpec(
            num_scalar_prefetch=0,
            grid=(B,),
            in_specs=[
                pl.BlockSpec((1, Skv, Dc), lambda b: (b, 0, 0)),
                _weight_spec((Dc, inner), single_buffer),
                _weight_spec((Dc, inner), single_buffer),
            ],
            out_specs=(pl.BlockSpec((1, Skv, inner), lambda b: (b, 0, 0)),
                       pl.BlockSpec((1, Skv, inner), lambda b: (b, 0, 0))),
        ),
        compiler_params=pltpu.CompilerParams(
            dimension_semantics=("parallel",),
            vmem_limit_bytes=vmem_limit),
    )(enc_bf16, wk, wv)


def _attention_call(hid_bf16, k, v, wq, wo, bo, out_dtype, heads, dim_head, tq,
                    *, vmem_limit, single_buffer):
    B, Sq, Dq = hid_bf16.shape
    _, Skv, inner = k.shape
    nq = Sq // tq
    kernel = partial(_cross_attn_kernel, heads=heads, dim_head=dim_head)
    return pl.pallas_call(
        kernel,
        out_shape=jax.ShapeDtypeStruct((B, Sq, Dq), out_dtype),
        grid_spec=pltpu.PrefetchScalarGridSpec(
            num_scalar_prefetch=0,
            grid=(B, nq),
            in_specs=[
                # activations: tiled over (batch, q-tile)
                pl.BlockSpec((1, tq, Dq), lambda b, qi: (b, qi, 0)),     # hidden
                # cached K/V: indexed by batch only (no per-tile re-DMA)
                pl.BlockSpec((1, Skv, inner), lambda b, qi: (b, 0, 0)),  # K
                pl.BlockSpec((1, Skv, inner), lambda b, qi: (b, 0, 0)),  # V
                # weights/bias: full arrays, constant index_map, single buffer
                _weight_spec((Dq, inner), single_buffer),                # Wq (scaled)
                _weight_spec((inner, Dq), single_buffer),                # Wo
                _weight_spec((1, Dq), single_buffer),                    # bo
            ],
            out_specs=pl.BlockSpec((1, tq, Dq), lambda b, qi: (b, qi, 0)),
        ),
        compiler_params=pltpu.CompilerParams(
            dimension_semantics=("parallel", "parallel"),
            vmem_limit_bytes=vmem_limit),
    )(hid_bf16, k, v, wq, wo, bo)


# ---------------------------------------------------------------------------
# Public API
# ---------------------------------------------------------------------------

def prepare_cross_attention_params(params, dim_head):
    """One-time weight prep, hoisted out of the per-call path.

    params use the PyTorch nn.Linear layout (out, in); we pre-transpose to
    (in, out), fold the attention scale into Wq, and cast to bf16 for the MXU.
    Bias stays f32.
    """
    scale = dim_head ** (-0.5)
    return {
        "wq": (jnp.asarray(params["to_q_w"]).T * scale).astype(jnp.bfloat16),  # (Dq, inner)
        "wk": jnp.asarray(params["to_k_w"]).T.astype(jnp.bfloat16),            # (Dc, inner)
        "wv": jnp.asarray(params["to_v_w"]).T.astype(jnp.bfloat16),            # (Dc, inner)
        "wo": jnp.asarray(params["to_out_w"]).T.astype(jnp.bfloat16),          # (inner, Dq)
        "bo": jnp.asarray(params["to_out_b"]).reshape(1, -1).astype(jnp.float32),
    }


def cross_attention_pallas(hidden_states, encoder_hidden_states, prepared,
                           heads, dim_head, *, block_q=None):
    """
    hidden_states:         (B, Sq, Dq)  float32 (cast to bf16 for DMA/MXU)
    encoder_hidden_states: (B, Skv, Dc) float32 or None (self-attention)
    prepared: output of prepare_cross_attention_params
    """
    if encoder_hidden_states is None:
        encoder_hidden_states = hidden_states
    B, Sq, Dq = hidden_states.shape
    _, Skv, Dc = encoder_hidden_states.shape
    inner = heads * dim_head

    # bf16 activations: halves HBM->VMEM DMA bytes (biggest relative win on v5e).
    hid_bf16 = hidden_states.astype(jnp.bfloat16)
    enc_bf16 = encoder_hidden_states.astype(jnp.bfloat16)

    capacity = _vmem_capacity_bytes()
    tq = block_q if block_q is not None else _choose_block_q(
        Sq, Dq, Skv, inner, heads, capacity)
    tq = min(tq, Sq)
    assert Sq % tq == 0 and (tq == Sq or tq % 8 == 0), (
        f"Sq={Sq} must be divisible by the query tile {tq}")

    est = _attn_vmem_estimate(tq, Dq, Skv, inner, heads)
    vmem_limit = int(min(max(2 * est, 32 * 1024 * 1024), int(0.9 * capacity)))

    def run(single_buffer):
        k, v = _kv_projection(enc_bf16, prepared["wk"], prepared["wv"],
                              vmem_limit=vmem_limit, single_buffer=single_buffer)
        return _attention_call(hid_bf16, k, v, prepared["wq"], prepared["wo"],
                               prepared["bo"], hidden_states.dtype,
                               heads, dim_head, tq,
                               vmem_limit=vmem_limit, single_buffer=single_buffer)

    try:
        return run(True)
    except Exception:
        # Fallback for JAX/Mosaic versions where pipeline_mode=pl.Buffered(1)
        # on top-level BlockSpecs is rejected at lowering.
        return run(False)


# ---------------------------------------------------------------------------
# Pure-JAX reference (matches the PyTorch forward, dropout=0 / eval)
# ---------------------------------------------------------------------------

def cross_attention_ref(hidden_states, encoder_hidden_states, params,
                        heads, dim_head):
    B, Sq, Dq = hidden_states.shape
    H, dh = heads, dim_head
    scale = dim_head ** (-0.5)

    q = hidden_states @ params["to_q_w"].T                         # (B, Sq,  inner)
    k = encoder_hidden_states @ params["to_k_w"].T                 # (B, Skv, inner)
    v = encoder_hidden_states @ params["to_v_w"].T                 # (B, Skv, inner)

    def split_heads(t):
        b, s, d = t.shape
        return t.reshape(b, s, H, dh).transpose(0, 2, 1, 3).reshape(b * H, s, dh)

    q, k, v = split_heads(q), split_heads(k), split_heads(v)
    scores = jnp.einsum("bqd,bkd->bqk", q, k) * scale
    probs = jax.nn.softmax(scores, axis=-1)
    attn = jnp.einsum("bqk,bkd->bqd", probs, v)                    # (B*H, Sq, dh)
    attn = attn.reshape(B, H, Sq, dh).transpose(0, 2, 1, 3).reshape(B, Sq, H * dh)
    return attn @ params["to_out_w"].T + params["to_out_b"]


# ---------------------------------------------------------------------------
# Demo / self-test
# ---------------------------------------------------------------------------

if __name__ == "__main__":
    # Module hyper-params (small)
    B = 2
    Sq = 16            # query sequence length
    Skv = 8            # encoder (key/value) sequence length
    query_dim = 32
    cross_attention_dim = 24
    heads = 4
    dim_head = 8
    inner_dim = heads * dim_head   # 32

    key = jax.random.PRNGKey(0)
    ks = jax.random.split(key, 7)

    # Deterministic synthetic parameters (PyTorch nn.Linear layout (out, in)).
    def init(k, shape, fan_in):
        bound = 1.0 / math.sqrt(fan_in)
        return jax.random.uniform(k, shape, jnp.float32, -bound, bound)

    params = {
        "to_q_w": init(ks[0], (inner_dim, query_dim), query_dim),
        "to_k_w": init(ks[1], (inner_dim, cross_attention_dim), cross_attention_dim),
        "to_v_w": init(ks[2], (inner_dim, cross_attention_dim), cross_attention_dim),
        "to_out_w": init(ks[3], (query_dim, inner_dim), inner_dim),
        "to_out_b": init(ks[4], (query_dim,), inner_dim),
    }

    hidden_states = jax.random.normal(ks[5], (B, Sq, query_dim), jnp.float32)
    encoder_hidden_states = jax.random.normal(
        ks[6], (B, Skv, cross_attention_dim), jnp.float32)

    # One-time weight prep (transpose, scale fold, bf16 cast).
    prepared = prepare_cross_attention_params(params, dim_head)

    out = cross_attention_pallas(hidden_states, encoder_hidden_states, prepared,
                                 heads, dim_head)
    out = jax.block_until_ready(out)

    ref = cross_attention_ref(hidden_states, encoder_hidden_states, params,
                              heads, dim_head)
    max_err = float(jnp.max(jnp.abs(out - ref)))
    # bf16 activations + bf16 MXU operands + approx reciprocal in the softmax
    # denominator -> compare against the f32 reference with a bf16 tolerance.
    assert jnp.allclose(out, ref, atol=5e-2, rtol=5e-2), f"max abs err {max_err}"

    # TODO(synk): group_norm / added_kv_proj_dim / attention_mask / dropout>0
    # branches are unused with default constructor args and not implemented.
    print("KERNEL_OK")
</pallas_src>

<mosaic_0001>
module attributes {stable_mosaic.version = 11 : i64} {
  func.func @_kv_proj_kernel(%arg0: i32, %arg1: memref<1x8x24xbf16, #tpu.memory_space<vmem>>, %arg2: memref<24x32xbf16, #tpu.memory_space<vmem>>, %arg3: memref<24x32xbf16, #tpu.memory_space<vmem>>, %arg4: memref<1x8x32xbf16, #tpu.memory_space<vmem>>, %arg5: memref<1x8x32xbf16, #tpu.memory_space<vmem>>) attributes {dimension_semantics = [#tpu.dimension_semantics<parallel>], iteration_bounds = array<i64: 2>, scalar_prefetch = 0 : i64, scratch_operands = 0 : i64, tpu.core_type = #tpu.core_type<tc>, window_params = [{transform_indices = @transform_0, window_bounds = array<i64: 1, 8, 24>}, {pipeline_mode = #tpu.pipeline_mode<synchronous>, transform_indices = @transform_1, window_bounds = array<i64: 24, 32>}, {pipeline_mode = #tpu.pipeline_mode<synchronous>, transform_indices = @transform_2, window_bounds = array<i64: 24, 32>}, {transform_indices = @transform_3, window_bounds = array<i64: 1, 8, 32>}, {transform_indices = @transform_4, window_bounds = array<i64: 1, 8, 32>}]} {
    %c0 = arith.constant 0 : index
    %c0_0 = arith.constant 0 : index
    %c0_1 = arith.constant 0 : index
    %0 = vector.load %arg1[%c0, %c0_0, %c0_1] : memref<1x8x24xbf16, #tpu.memory_space<vmem>>, vector<1x8x24xbf16>
    %1 = vector.shape_cast %0 : vector<1x8x24xbf16> to vector<8x24xbf16>
    %c0_2 = arith.constant 0 : index
    %c0_3 = arith.constant 0 : index
    %2 = vector.load %arg2[%c0_2, %c0_3] : memref<24x32xbf16, #tpu.memory_space<vmem>>, vector<24x32xbf16>
    %cst = arith.constant dense<0.000000e+00> : vector<8x32xf32>
    %3 = tpu.matmul %1, %2, %cst {dimension_numbers = #tpu.dot_dimension_numbers<[1], [0], [0], [1], [0, 0, 1, 1], [], []>} : vector<8x24xbf16>, vector<24x32xbf16>, vector<8x32xf32> -> vector<8x32xf32>
    %4 = arith.truncf %3 : vector<8x32xf32> to vector<8x32xbf16>
    %c0_4 = arith.constant 0 : index
    %c0_5 = arith.constant 0 : index
    %c0_6 = arith.constant 0 : index
    %5 = vector.load %arg4[%c0_4, %c0_5, %c0_6] : memref<1x8x32xbf16, #tpu.memory_space<vmem>>, vector<1x8x32xbf16>
    %6 = vector.shape_cast %5 : vector<1x8x32xbf16> to vector<8x32xbf16>
    %7 = vector.shape_cast %4 : vector<8x32xbf16> to vector<1x8x32xbf16>
    tpu.vector_store %arg4[%c0_4, %c0_5, %c0_6], %7 {strides = array<i32>} : memref<1x8x32xbf16, #tpu.memory_space<vmem>>, vector<1x8x32xbf16>,
    %c0_7 = arith.constant 0 : index
    %c0_8 = arith.constant 0 : index
    %8 = vector.load %arg3[%c0_7, %c0_8] : memref<24x32xbf16, #tpu.memory_space<vmem>>, vector<24x32xbf16>
    %cst_9 = arith.constant dense<0.000000e+00> : vector<8x32xf32>
    %9 = tpu.matmul %1, %8, %cst_9 {dimension_numbers = #tpu.dot_dimension_numbers<[1], [0], [0], [1], [0, 0, 1, 1], [], []>} : vector<8x24xbf16>, vector<24x32xbf16>, vector<8x32xf32> -> vector<8x32xf32>
    %10 = arith.truncf %9 : vector<8x32xf32> to vector<8x32xbf16>
    %c0_10 = arith.constant 0 : index
    %c0_11 = arith.constant 0 : index
    %c0_12 = arith.constant 0 : index
    %11 = vector.load %arg5[%c0_10, %c0_11, %c0_12] : memref<1x8x32xbf16, #tpu.memory_space<vmem>>, vector<1x8x32xbf16>
    %12 = vector.shape_cast %11 : vector<1x8x32xbf16> to vector<8x32xbf16>
    %13 = vector.shape_cast %10 : vector<8x32xbf16> to vector<1x8x32xbf16>
    tpu.vector_store %arg5[%c0_10, %c0_11, %c0_12], %13 {strides = array<i32>} : memref<1x8x32xbf16, #tpu.memory_space<vmem>>, vector<1x8x32xbf16>,
    return
  }
  func.func @transform_0(%arg0: i32) -> (i32, i32, i32) {
    %c0_i32 = arith.constant 0 : i32
    %c0_i32_0 = arith.constant 0 : i32
    %c0_i32_1 = arith.constant 0 : i32
    return %arg0, %c0_i32, %c0_i32_0 : i32, i32, i32
  }
  func.func @transform_1(%arg0: i32) -> (i32, i32) {
    %c0_i32 = arith.constant 0 : i32
    %c0_i32_0 = arith.constant 0 : i32
    %c0_i32_1 = arith.constant 0 : i32
    return %c0_i32, %c0_i32_0 : i32, i32
  }
  func.func @transform_2(%arg0: i32) -> (i32, i32) {
    %c0_i32 = arith.constant 0 : i32
    %c0_i32_0 = arith.constant 0 : i32
    %c0_i32_1 = arith.constant 0 : i32
    return %c0_i32, %c0_i32_0 : i32, i32
  }
  func.func @transform_3(%arg0: i32) -> (i32, i32, i32) {
    %c0_i32 = arith.constant 0 : i32
    %c0_i32_0 = arith.constant 0 : i32
    %c0_i32_1 = arith.constant 0 : i32
    return %arg0, %c0_i32, %c0_i32_0 : i32, i32, i32
  }
  func.func @transform_4(%arg0: i32) -> (i32, i32, i32) {
    %c0_i32 = arith.constant 0 : i32
    %c0_i32_0 = arith.constant 0 : i32
    %c0_i32_1 = arith.constant 0 : i32
    return %arg0, %c0_i32, %c0_i32_0 : i32, i32, i32
  }
}

module attributes {stable_mosaic.version = 11 : i64} {
  func.func @_kv_proj_kernel(%arg0: i32, %arg1: memref<1x8x24xbf16, #tpu.memory_space<vmem>>, %arg2: memref<24x32xbf16, #tpu.memory_space<vmem>>, %arg3: memref<24x32xbf16, #tpu.memory_space<vmem>>, %arg4: memref<1x8x32xbf16, #tpu.memory_space<vmem>>, %arg5: memref<1x8x32xbf16, #tpu.memory_space<vmem>>) attributes {dimension_semantics = [#tpu.dimension_semantics<parallel>], iteration_bounds = array<i64: 2>, scalar_prefetch = 0 : i64, scratch_operands = 0 : i64, tpu.core_type = #tpu.core_type<tc>, window_params = [{transform_indices = @transform_0, window_bounds = array<i64: 1, 8, 24>}, {pipeline_mode = #tpu.pipeline_mode<synchronous>, transform_indices = @transform_1, window_bounds = array<i64: 24, 32>}, {pipeline_mode = #tpu.pipeline_mode<synchronous>, transform_indices = @transform_2, window_bounds = array<i64: 24, 32>}, {transform_indices = @transform_3, window_bounds = array<i64: 1, 8, 32>}, {transform_indices = @transform_4, window_bounds = array<i64: 1, 8, 32>}]} {
    %c0 = arith.constant 0 : index
    %c0_0 = arith.constant 0 : index
    %c0_1 = arith.constant 0 : index
    %0 = vector.load %arg1[%c0, %c0_0, %c0_1] : memref<1x8x24xbf16, #tpu.memory_space<vmem>>, vector<1x8x24xbf16>
    %1 = vector.shape_cast %0 : vector<1x8x24xbf16> to vector<8x24xbf16>
    %c0_2 = arith.constant 0 : index
    %c0_3 = arith.constant 0 : index
    %2 = vector.load %arg2[%c0_2, %c0_3] : memref<24x32xbf16, #tpu.memory_space<vmem>>, vector<24x32xbf16>
    %cst = arith.constant dense<0.000000e+00> : vector<8x32xf32>
    %3 = tpu.matmul %1, %2, %cst {dimension_numbers = #tpu.dot_dimension_numbers<[1], [0], [0], [1], [0, 0, 1, 1], [], []>} : vector<8x24xbf16>, vector<24x32xbf16>, vector<8x32xf32> -> vector<8x32xf32>
    %4 = arith.truncf %3 : vector<8x32xf32> to vector<8x32xbf16>
    %c0_4 = arith.constant 0 : index
    %c0_5 = arith.constant 0 : index
    %c0_6 = arith.constant 0 : index
    %5 = vector.load %arg4[%c0_4, %c0_5, %c0_6] : memref<1x8x32xbf16, #tpu.memory_space<vmem>>, vector<1x8x32xbf16>
    %6 = vector.shape_cast %5 : vector<1x8x32xbf16> to vector<8x32xbf16>
    %7 = vector.shape_cast %4 : vector<8x32xbf16> to vector<1x8x32xbf16>
    tpu.vector_store %arg4[%c0_4, %c0_5, %c0_6], %7 {strides = array<i32>} : memref<1x8x32xbf16, #tpu.memory_space<vmem>>, vector<1x8x32xbf16>,
    %c0_7 = arith.constant 0 : index
    %c0_8 = arith.constant 0 : index
    %8 = vector.load %arg3[%c0_7, %c0_8] : memref<24x32xbf16, #tpu.memory_space<vmem>>, vector<24x32xbf16>
    %cst_9 = arith.constant dense<0.000000e+00> : vector<8x32xf32>
    %9 = tpu.matmul %1, %8, %cst_9 {dimension_numbers = #tpu.dot_dimension_numbers<[1], [0], [0], [1], [0, 0, 1, 1], [], []>} : vector<8x24xbf16>, vector<24x32xbf16>, vector<8x32xf32> -> vector<8x32xf32>
    %10 = arith.truncf %9 : vector<8x32xf32> to vector<8x32xbf16>
    %c0_10 = arith.constant 0 : index
    %c0_11 = arith.constant 0 : index
    %c0_12 = arith.constant 0 : index
    %11 = vector.load %arg5[%c0_10, %c0_11, %c0_12] : memref<1x8x32xbf16, #tpu.memory_space<vmem>>, vector<1x8x32xbf16>
    %12 = vector.shape_cast %11 : vector<1x8x32xbf16> to vector<8x32xbf16>
    %13 = vector.shape_cast %10 : vector<8x32xbf16> to vector<1x8x32xbf16>
    tpu.vector_store %arg5[%c0_10, %c0_11, %c0_12], %13 {strides = array<i32>} : memref<1x8x32xbf16, #tpu.memory_space<vmem>>, vector<1x8x32xbf16>,
    return
  }
  func.func @transform_0(%arg0: i32) -> (i32, i32, i32) {
    %c0_i32 = arith.constant 0 : i32
    %c0_i32_0 = arith.constant 0 : i32
    %c0_i32_1 = arith.constant 0 : i32
    return %arg0, %c0_i32, %c0_i32_0 : i32, i32, i32
  }
  func.func @transform_1(%arg0: i32) -> (i32, i32) {
    %c0_i32 = arith.constant 0 : i32
    %c0_i32_0 = arith.constant 0 : i32
    %c0_i32_1 = arith.constant 0 : i32
    return %c0_i32, %c0_i32_0 : i32, i32
  }
  func.func @transform_2(%arg0: i32) -> (i32, i32) {
    %c0_i32 = arith.constant 0 : i32
    %c0_i32_0 = arith.constant 0 : i32
    %c0_i32_1 = arith.constant 0 : i32
    return %c0_i32, %c0_i32_0 : i32, i32
  }
  func.func @transform_3(%arg0: i32) -> (i32, i32, i32) {
    %c0_i32 = arith.constant 0 : i32
    %c0_i32_0 = arith.constant 0 : i32
    %c0_i32_1 = arith.constant 0 : i32
    return %arg0, %c0_i32, %c0_i32_0 : i32, i32, i32
  }
  func.func @transform_4(%arg0: i32) -> (i32, i32, i32) {
    %c0_i32 = arith.constant 0 : i32
    %c0_i32_0 = arith.constant 0 : i32
    %c0_i32_1 = arith.constant 0 : i32
    return %arg0, %c0_i32, %c0_i32_0 : i32, i32, i32
  }
}

</mosaic_0001>

<bundles_post_ra>
// kernel: tpu_custom_call.1
= control target key start
LH: loop header
LB: loop body
LE: loop exit
PB: predicated region body
PF: predicated region fallthrough
CT: control target
= control target key end

     0   :  { %10 = vsyncpa [#allocation3], 0  ;;  %s1148_s0 = inlined_call_operand.hbm [shape: bf16[2,8,24], index: 0, kind: input, shape index: {}]   ;;  %s1149_s1 = inlined_call_operand.hbm [shape: bf16[24,32], index: 1, kind: input, shape index: {}]   ;;  %s1150_s2 = inlined_call_operand.hbm [shape: bf16[24,32], index: 2, kind: input, shape index: {}]   ;;  %s1151_s3 = inlined_call_operand.hbm [shape: bf16[2,8,32], index: 3, kind: output, shape index: {0}]   ;;  %s1152_s4 = inlined_call_operand.hbm [shape: bf16[2,8,32], index: 4, kind: output, shape index: {1}]  }
   0x1   :  { %12 = vsyncpa [#allocation3 + $0x1], 0 }
   0x2   :  { %13 = vsyncpa [#allocation6], 0 }
   0x3   :  { %14 = vsyncpa [#allocation4], 0 }
   0x4   :  { %16 = vsyncpa [#allocation4 + $0x1], 0 }
   0x5   :  { %17 = vsyncpa [#allocation10], 0 }
   0x6   :  { %19 = vsyncpa [#allocation10 + $0x1], 0  ;;  %s879_s15 = smov 0   ;;  %s881_s16 = smov 0  }
   0x7   :  { %s883_s17 = smov 0   ;;  %s885_s18 = smov 0  }
   0x8 LB: > { %s900_s19 = sadd.s32 4294967295, %s843_s18   ;;  %s528_s20 = sadd.s32 4294967294, %s843_s18   ;;  %s843_s18 = sphi %s885_s18, %s1172_s18   ;;  %s839_s17 = sphi %s883_s17, %s1171_s17   ;;  %s835_s16 = sphi %s881_s16, %s1170_s16   ;;  %s831_s15 = sphi %s879_s15, %s1169_s15  }
   0x9   : > { %p45_p0 = scmp.ne.s32.totalorder %s835_s16, %s831_s15  ;;  %p1153_p1 = scmp.eq.s32.totalorder %s900_s19, 0 }
   0xa   : > { %p117_p3 = scmp.eq.s32.totalorder %s528_s20, 1  ;;  %p529_p5 = scmp.ge.s32.totalorder %s843_s18, 1 }
   0xb   : > { %p909_p4 = por %p1153_p1, %p45_p0  ;;  %p150_p7 = scmp.lt.s32.totalorder %s843_s18, 3 }
   0xc   : > { %p914_p6 = por %p117_p3, %p45_p0  ;;  %s845_s24 = smov [#allocation5]  }
   0xd   : > { %s1156_s21 = scalar_select %p909_p4, 1, 0 }
   0xe   : > { %s1157_s22 = scalar_select %p914_p6, 1, 0 }
   0xf   : > { %p919_p8 = pnand %p529_p5, %p150_p7  ;;  %s162_s25 = sshll.u32 %s845_s24, 4  ;;  %s923_s25 = int_to_ptr.vmem [resolvable:$true] %s162_s25 }
  0x10   : > { %s846_s27 = smov [#allocation7]   ;;  %s655_s5 = scalar_lea.hbm %s1149_s1, 192 }
  0x11   : > { %p589_p9 = pneg %p919_p8  ;;  %s175_s28 = sshll.u32 %s846_s27, 4  ;;  %s934_s28 = int_to_ptr.vmem [resolvable:$true] %s175_s28 }
  0x12   : > { %p656_p12 = scmp.ne.s32.totalorder %s1149_s1, %s655_s5  ;;  %p662_p5 = scmp.lt.u32.totalorder %s655_s5, %s1149_s1 }
  0x13   : > { %p930_p11 = pnand %p589_p9, %p1153_p1 }
  0x15   : > { %p657_p13 = pneg %p930_p11 }
  0x17   : > { %p658_p0 = pnand %p657_p13, %p656_p12 }
  0x19   : > { %p659_p3 = pneg %p658_p0 }
  0x1b   : > { %p664_p7 = pnand %p662_p5, %p659_p3 }
  0x1d   : > { %667 = shalt.err (!%p664_p7)
}
  0x1e   : > { %s668_s10 = scalar_lea.vmem %s923_s25, 192  ;;  %p676_p2 = scmp.lt.s32.totalorder %s923_s25, %s923_s25 }
  0x1f   : > { %p669_p9 = scmp.ne.s32.totalorder %s923_s25, %s668_s10  ;;  %p677_p12 = scmp.lt.s32.totalorder %s668_s10, %s668_s10 }
  0x21   : > { %p671_p10 = pnand %p669_p9, %p657_p13  ;;  %p678_p0 = por %p677_p12, %p676_p2 }
  0x23   : > { %p672_p1 = pneg %p671_p10 }
  0x25   : > { %p679_p6 = pnand %p678_p0, %p672_p1 }
  0x27   : > { %682 = shalt.err (!%p679_p6)
}
  0x28   : > { %s847_s11 = smov 64   ;;  %s848_s12 = smov 4  }
  0x29   : > { %592 = dma.hbm_to_vmem [thread:$0]  (!%p930_p11), %s1149_s1, 192, %s923_s25, [#allocation6], %s847_s11, %s847_s11, %s848_s12  }
  0x2a   : > { %s683_s27 = scalar_lea.hbm %s1150_s2, 192 }
  0x2b   : > { %p684_p2 = scmp.ne.s32.totalorder %s1150_s2, %s683_s27  ;;  %p690_p10 = scmp.lt.u32.totalorder %s683_s27, %s1150_s2 }
  0x2d   : > { %p686_p1 = pnand %p684_p2, %p657_p13 }
  0x2f   : > { %p687_p6 = pneg %p686_p1 }
  0x31   : > { %p692_p3 = pnand %p690_p10, %p687_p6 }
  0x33   : > { %695 = shalt.err (!%p692_p3)
}
  0x34   : > { %s696_s25 = scalar_lea.vmem %s934_s28, 192  ;;  %p704_p12 = scmp.lt.s32.totalorder %s934_s28, %s934_s28 }
  0x35   : > { %p697_p5 = scmp.ne.s32.totalorder %s934_s28, %s696_s25  ;;  %p705_p0 = scmp.lt.s32.totalorder %s696_s25, %s696_s25 }
  0x37   : > { %p699_p7 = pnand %p697_p5, %p657_p13  ;;  %p706_p2 = por %p705_p0, %p704_p12 }
  0x39   : > { %p700_p9 = pneg %p699_p7 }
  0x3b   : > { %p707_p1 = pnand %p706_p2, %p700_p9 }
  0x3d   : > { %710 = shalt.err (!%p707_p1)
}
  0x3e   : > { %595 = dma.hbm_to_vmem [thread:$0]  (!%p930_p11), %s1150_s2, 192, %s934_s28, [#allocation6], %s847_s11, %s847_s11, %s848_s12  }
  0x3f   : > { %s989_s9 = sadd.s32 1, %s843_s18   ;;  %s32_s26 = sadd.s32 1, %s839_s17 }
  0x40   : > { %s29_s10 = ssub.s32 %s843_s18, %s989_s9  ;;  %p39_p13 = scmp.ne.s32.totalorder %s839_s17, %s835_s16 }
  0x41   : > { %p30_p6 = scmp.eq.s32.totalorder %s29_s10, 0  ;;  %p40_p10 = scmp.eq.s32.totalorder %s843_s18, 0 }
  0x42   : > { %p1160_p3 = scmp.eq.s32.totalorder %s900_s19, 1  ;;  %p609_p7 = scmp.lt.s32.totalorder %s843_s18, 2 }
  0x43   : > { %s1005_s14 = scalar_select %p30_p6, %s839_s17, %s32_s26  }
  0x44   : > { %p999_p5 = por %p1160_p3, %p39_p13  ;;  %p41_p9 = por %p40_p10, %p39_p13 }
  0x45   : > { %s189_s20 = sand.u32 1, %s839_s17   ;;  %s534_s28 = sshll.u32 %s843_s18, 6 }
  0x46   : > { %s1161_s13 = scalar_select %p999_p5, 1, 0 }
  0x47   : > { %s533_s24 = sshll.u32 %s189_s20, 2  ;;  %s1012_s27 = scalar_lea.hbm %s1148_s0, %s534_s28 }
  0x48   : > { %s193_s29 = scalar_lea.vmem [#allocation2], %s533_s24  ;;  %p1016_p11 = pnand %p609_p7, %p41_p9 }
  0x49   : > { %s200_s30 = sshll.u32 %s193_s29, 4  ;;  %s190_s6 = scalar_lea.sflag [#allocation3], %s189_s20  ;;  %s1014_s30 = int_to_ptr.vmem [resolvable:$true] %s200_s30 }
  0x4a   : > { %s711_s25 = scalar_lea.hbm %s1012_s27, 64  ;;  %p713_p0 = pneg %p1016_p11 }
  0x4b   : > { %p712_p12 = scmp.ne.s32.totalorder %s1012_s27, %s711_s25  ;;  %s716_s26 = scalar_lea.hbm %s1148_s0, 128 }
  0x4c   : > { %p717_p13 = scmp.lt.u32.totalorder %s1012_s27, %s1148_s0  ;;  %p718_p6 = scmp.lt.u32.totalorder %s716_s26, %s711_s25 }
  0x4d   : > { %p714_p2 = pnand %p713_p0, %p712_p12  ;;  %p720_p3 = scmp.lt.u32.totalorder %s711_s25, %s1012_s27 }
  0x4e   : > { %p719_p10 = por %p718_p6, %p717_p13 }
  0x4f   : > { %p715_p1 = pneg %p714_p2 }
  0x50   : > { %p721_p7 = por %p720_p3, %p719_p10 }
  0x52   : > { %p722_p9 = pnand %p721_p7, %p715_p1 }
  0x54   : > { %725 = shalt.err (!%p722_p9)
}
  0x55   : > { %s726_s20 = scalar_lea.vmem %s1014_s30, 64  ;;  %s849_s28 = smov [#allocation2]  }
  0x56   : > { %p727_p12 = scmp.ne.s32.totalorder %s1014_s30, %s726_s20  ;;  %s731_s11 = sshll.u32 %s849_s28, 4  ;;  %s732_s11 = int_to_ptr.vmem [resolvable:$false] %s731_s11 }
  0x57   : > { %s733_s12 = scalar_lea.vmem %s732_s11, 128  ;;  %p734_p4 = scmp.lt.s32.totalorder %s1014_s30, %s732_s11 }
  0x58   : > { %p729_p2 = pnand %p727_p12, %p713_p0  ;;  %p735_p13 = scmp.lt.s32.totalorder %s733_s12, %s726_s20 }
  0x5a   : > { %p730_p5 = pneg %p729_p2  ;;  %p736_p6 = por %p735_p13, %p734_p4 }
  0x5c   : > { %p737_p10 = pnand %p736_p6, %p730_p5 }
  0x5e   : > { %740 = shalt.err (!%p737_p10)
}
  0x5f   : > { %599 = dma.hbm_to_vmem [thread:$0]  (!%p1016_p11), %s1012_s27, 64, %s1014_s30, %s190_s6  }
  0x60   : > { %209 = sbr.rel (%p919_p8) target bundleno = 368 (0x170), region = 32  ;;  %s1048_s29 = sand.u32 (!%p919_p8), 1, %s835_s16  }
  0x61   : > { %s1051_s25 = sshll.u32 (!%p919_p8), %s1048_s29, 2  ;;  %s212_s7 = scalar_lea.sflag (!%p919_p8), [#allocation3], %s1048_s29 }
  0x62   : > { %s215_s8 = scalar_lea.vmem (!%p919_p8), [#allocation2], %s1051_s25  ;;  %p1163_p4 = scmp.ne.s32.totalorder (!%p919_p8), %s1156_s21, 0 }
  0x67   : > { %814 = dma.done.wait (%p1163_p4), %s212_s7, 64  }
  0x68   : > { %816 = vsyncadd (%p1163_p4), %s212_s7, 4294967232  ;;  %p1164_p5 = scmp.eq.s32.totalorder %s900_s19, 0 }
  0x6a   : > { %818 = dma.done.wait (%p1164_p5), [#allocation6], 384   ;;  %p1165_p8 = pmov %p1164_p5 }
  0x6b   : > { %v850_v0 = vmov 0.0   ;;  %vm851_vm0 = vmmov 0   ;;  %v651_v1 = vld [vmem:[#allocation5] sm:$0xff]   ;;  %v652_v2 = vld [vmem:[#allocation7] sm:$0xff]   ;;  %vm271_vm1 = vcmask 1043456   ;;  %vm267_vm2 = vcmask 195584  }
  0x6c   : > { %820 = vsyncadd (%p1165_p8), [#allocation6], 4294966912  ;;  %559 = vmatprep.subr.bf16.mxu0 %v850_v0  ;;  %567 = vmatprep.subr.bf16.mxu1 %v850_v0  ;;  %v653_v3 = vld [vmem:[#allocation5 + $0x8] ss:$0 sps:$4 sm:$0xff]   ;;  %v654_v4 = vld [vmem:[#allocation7 + $0x8] ss:$0 sps:$4 sm:$0xff]  }
  0x6d   : > { %563 = vmatprep.mubr.msk.bf16.mxu0 %vm851_vm0, %v850_v0  ;;  %571 = vmatprep.mubr.msk.bf16.mxu1 %vm851_vm0, %v850_v0  ;;  %v273_v5 = vsel %vm271_vm1, %v653_v3, 0  ;;  %v331_v6 = vsel %vm271_vm1, %v654_v4, 0  ;;  %v254_v7 = vld [vmem:[%s215_s8] sm:$0xf]  ;;  %s549_s21 = sshll.u32 %s900_s19, 6  ;;  %s245_s23 = scalar_lea.vmem [#allocation8], %s1051_s25 }
  0x6e   : > { %560 = vmatpush3.bf16.msra.mxu0 %v651_v1  ;;  %568 = vmatpush3.bf16.msra.mxu1 %v652_v2  ;;  %s394_s27 = sshll.u32 %s245_s23, 4  ;;  %s252_s30 = scalar_lea.vmem [#allocation9], %s1051_s25  ;;  %vm316_vm3 = vcmask 257024   ;;  %s1073_s27 = int_to_ptr.vmem [resolvable:$true] %s394_s27 }
  0x6f   : > { %561 = vmatprep.subr.bf16.mxu0 %v850_v0  ;;  %569 = vmatprep.subr.bf16.mxu1 %v850_v0  ;;  %s407_s5 = sshll.u32 %s252_s30, 4  ;;  %s1071_s10 = scalar_lea.hbm %s1151_s3, %s549_s21  ;;  %s1080_s5 = int_to_ptr.vmem [resolvable:$true] %s407_s5 }
  0x70   : > { %s1078_s20 = scalar_lea.hbm %s1152_s4, %s549_s21  ;;  %s376_s28 = scalar_lea.sflag [#allocation4], %s1048_s29 }
  0x71   : > { %s741_s11 = scalar_lea.vmem %s1073_s27, 64  ;;  %p1166_p0 = scmp.ne.s32.totalorder %s1161_s13, 0 }
  0x72   : > { %562 = vmatpush3.bf16.msra.mxu0 %v273_v5  ;;  %570 = vmatpush3.bf16.msra.mxu1 %v331_v6  ;;  %p742_p11 = scmp.ne.s32.totalorder %s1073_s27, %s741_s11  ;;  %s852_s12 = smov [#allocation8]  }
  0x73   : > { %s745_s7 = sshll.u32 %s852_s12, 4  ;;  %s746_s7 = int_to_ptr.vmem [resolvable:$false] %s745_s7 }
  0x74   : > { %p743_p1 = pnand %p742_p11, %p1166_p0  ;;  %s747_s8 = scalar_lea.vmem %s746_s7, 128 }
  0x75   : > { %564 = vmatmul.mubr.msk.bf16.vlgmr.msra.gmra.mrb[0].mxu0 %vm267_vm2, %v254_v7  ;;  %572 = vmatmul.mubr.msk.bf16.vlgmr.msra.gmra.mrb[0].mxu1 %vm267_vm2, %v254_v7  ;;  %p748_p7 = scmp.lt.s32.totalorder %s1073_s27, %s746_s7  ;;  %p749_p9 = scmp.lt.s32.totalorder %s747_s8, %s741_s11 }
  0x76   : > { %p744_p3 = pneg %p743_p1 }
  0x77   : > { %p750_p12 = por %p749_p9, %p748_p7 }
  0x79   : > { %p751_p2 = pnand %p750_p12, %p744_p3 }
 0x148   : > { %v309_v8 = vpop.f32.mrb[0].mxu0  ;;  %v367_v10 = vpop.f32.mrb[0].mxu1 }
 0x149   : > { %v315_v9 = vpack.c.bf16 %v309_v8, %v309_v8  ;;  %v565_v11 = vpop.f32.mrb[1].mxu0  ;;  %v373_v12 = vpack.c.bf16 %v367_v10, %v367_v10  ;;  %v573_v13 = vpop.f32.mrb[1].mxu1 }
 0x14a   : > { %v312_v14 = vpop.f32.mrb[2].mxu0  ;;  %v370_v15 = vpop.f32.mrb[2].mxu1 }
 0x14b   : > { %v566_v16 = vpop.f32.mrb[3].mxu0  ;;  %317 = vst.msk [vmem:[%s245_s23] sm:$0xf] %vm316_vm3, %v315_v9  ;;  %v574_v17 = vpop.f32.mrb[3].mxu1 }
 0x14c   : > { %754 = shalt.err (!%p751_p2)
}
 0x14d   : > { %s755_s21 = scalar_lea.hbm %s1071_s10, 64  ;;  %s759_s26 = scalar_lea.hbm %s1151_s3, 128 }
 0x14e   : > { %p756_p13 = scmp.ne.s32.totalorder %s1071_s10, %s755_s21  ;;  %p760_p4 = scmp.lt.u32.totalorder %s1071_s10, %s1151_s3 }
 0x14f   : > { %p761_p5 = scmp.lt.u32.totalorder %s759_s26, %s755_s21  ;;  %p763_p11 = scmp.lt.u32.totalorder %s755_s21, %s1071_s10 }
 0x150   : > { %p757_p6 = pnand %p756_p13, %p1166_p0 }
 0x151   : > { %p762_p8 = por %p761_p5, %p760_p4 }
 0x152   : > { %p758_p10 = pneg %p757_p6 }
 0x153   : > { %p764_p1 = por %p763_p11, %p762_p8 }
 0x155   : > { %p765_p3 = pnand %p764_p1, %p758_p10 }
 0x157   : > { %768 = shalt.err (!%p765_p3)
}
 0x158   : > { %585 = dma.vmem_to_hbm [thread:$0]  (%p1166_p0), %s1073_s27, 64, %s1071_s10, %s376_s28   ;;  %374 = vst.msk [vmem:[%s252_s30] sm:$0xf] %vm316_vm3, %v373_v12 }
 0x159   : > { %s381_s11 = scalar_lea.sflag [#allocation10], %s1048_s29  ;;  %s769_s12 = scalar_lea.vmem %s1080_s5, 64 }
 0x15a   : > { %p770_p7 = scmp.ne.s32.totalorder %s1080_s5, %s769_s12  ;;  %s853_s7 = smov [#allocation9]  }
 0x15b   : > { %s773_s8 = sshll.u32 %s853_s7, 4  ;;  %s774_s8 = int_to_ptr.vmem [resolvable:$false] %s773_s8 }
 0x15c   : > { %p771_p9 = pnand %p770_p7, %p1166_p0  ;;  %s775_s21 = scalar_lea.vmem %s774_s8, 128 }
 0x15d   : > { %p776_p2 = scmp.lt.s32.totalorder %s1080_s5, %s774_s8  ;;  %p777_p13 = scmp.lt.s32.totalorder %s775_s21, %s769_s12 }
 0x15e   : > { %p772_p12 = pneg %p771_p9 }
 0x15f   : > { %p778_p6 = por %p777_p13, %p776_p2 }
 0x161   : > { %p779_p10 = pnand %p778_p6, %p772_p12 }
 0x163   : > { %782 = shalt.err (!%p779_p10)
}
 0x164   : > { %s783_s29 = scalar_lea.hbm %s1078_s20, 64  ;;  %s787_s30 = scalar_lea.hbm %s1152_s4, 128 }
 0x165   : > { %p784_p4 = scmp.ne.s32.totalorder %s1078_s20, %s783_s29  ;;  %p788_p11 = scmp.lt.u32.totalorder %s1078_s20, %s1152_s4 }
 0x166   : > { %p789_p1 = scmp.lt.u32.totalorder %s787_s30, %s783_s29  ;;  %p791_p7 = scmp.lt.u32.totalorder %s783_s29, %s1078_s20 }
 0x167   : > { %p785_p5 = pnand %p784_p4, %p1166_p0 }
 0x168   : > { %p790_p3 = por %p789_p1, %p788_p11 }
 0x169   : > { %p786_p8 = pneg %p785_p5 }
 0x16a   : > { %p792_p9 = por %p791_p7, %p790_p3 }
 0x16c   : > { %p793_p12 = pnand %p792_p9, %p786_p8 }
 0x16e   : > { %796 = shalt.err (!%p793_p12)
}
 0x16f   : > { %586 = dma.vmem_to_hbm [thread:$0]  (%p1166_p0), %s1080_s5, 64, %s1078_s20, %s381_s11  }
 0x170 PF: > { %s419_s23 = sand.u32 1, %s831_s15   ;;  %p1167_p2 = scmp.ne.s32.totalorder %s1157_s22, 0 }
 0x171   : > { %p1168_p13 = scmp.ge.s32.totalorder %s843_s18, 2  ;;  %s420_s6 = scalar_lea.sflag [#allocation4], %s419_s23 }
 0x173   : > { %p601_p6 = pnand %p1168_p13, %p1167_p2 }
 0x175   : > { %822 = dma.done.wait (!%p601_p6), %s420_s6, 64  }
 0x176   : > { %824 = vsyncadd (!%p601_p6), %s420_s6, 4294967232  ;;  %s429_s26 = scalar_lea.sflag [#allocation10], %s419_s23 }
 0x177   : > { %826 = dma.done.wait (!%p601_p6), %s429_s26, 64  }
 0x178   : > { %828 = vsyncadd (!%p601_p6), %s429_s26, 4294967232  ;;  %p22_p0 = scmp.ge.s32.totalorder %s989_s9, 4   ;;  %s1169_s15 = smov %s835_s16 }
 0x179   : > { %s1170_s16 = smov %s839_s17  ;;  %s1171_s17 = smov %s1005_s14 }
 0x17a   : > { %s1172_s18 = smov %s989_s9  ;;  %24 = sbr.rel (!%p22_p0) target bundleno = 8 (0x8), region = 102 }
 0x181   :  { %434 = vsyncpa [#allocation3], 1 }
 0x182   :  { %436 = vsyncpa [#allocation3 + $0x1], 1 }
 0x183   :  { %437 = vsyncpa [#allocation6], 1 }
 0x184   :  { %438 = vsyncpa [#allocation4], 1 }
 0x185   :  { %440 = vsyncpa [#allocation4 + $0x1], 1 }
 0x186   :  { %441 = vsyncpa [#allocation10], 1 }
 0x187   :  { %443 = vsyncpa [#allocation10 + $0x1], 1 }

// kernel: tpu_custom_call.1
= control target key start
LH: loop header
LB: loop body
LE: loop exit
PB: predicated region body
PF: predicated region fallthrough
CT: control target
= control target key end

     0   :  { %10 = vsyncpa [#allocation3], 0  ;;  %s1148_s0 = inlined_call_operand.hbm [shape: bf16[2,8,24], index: 0, kind: input, shape index: {}]   ;;  %s1149_s1 = inlined_call_operand.hbm [shape: bf16[24,32], index: 1, kind: input, shape index: {}]   ;;  %s1150_s2 = inlined_call_operand.hbm [shape: bf16[24,32], index: 2, kind: input, shape index: {}]   ;;  %s1151_s3 = inlined_call_operand.hbm [shape: bf16[2,8,32], index: 3, kind: output, shape index: {0}]   ;;  %s1152_s4 = inlined_call_operand.hbm [shape: bf16[2,8,32], index: 4, kind: output, shape index: {1}]  }
   0x1   :  { %12 = vsyncpa [#allocation3 + $0x1], 0 }
   0x2   :  { %13 = vsyncpa [#allocation6], 0 }
   0x3   :  { %14 = vsyncpa [#allocation4], 0 }
   0x4   :  { %16 = vsyncpa [#allocation4 + $0x1], 0 }
   0x5   :  { %17 = vsyncpa [#allocation10], 0 }
   0x6   :  { %19 = vsyncpa [#allocation10 + $0x1], 0  ;;  %s879_s15 = smov 0   ;;  %s881_s16 = smov 0  }
   0x7   :  { %s883_s17 = smov 0   ;;  %s885_s18 = smov 0  }
   0x8 LB: > { %s900_s19 = sadd.s32 4294967295, %s843_s18   ;;  %s528_s20 = sadd.s32 4294967294, %s843_s18   ;;  %s843_s18 = sphi %s885_s18, %s1172_s18   ;;  %s839_s17 = sphi %s883_s17, %s1171_s17   ;;  %s835_s16 = sphi %s881_s16, %s1170_s16   ;;  %s831_s15 = sphi %s879_s15, %s1169_s15  }
   0x9   : > { %p45_p0 = scmp.ne.s32.totalorder %s835_s16, %s831_s15  ;;  %p1153_p1 = scmp.eq.s32.totalorder %s900_s19, 0 }
   0xa   : > { %p117_p3 = scmp.eq.s32.totalorder %s528_s20, 1  ;;  %p529_p5 = scmp.ge.s32.totalorder %s843_s18, 1 }
   0xb   : > { %p909_p4 = por %p1153_p1, %p45_p0  ;;  %p150_p7 = scmp.lt.s32.totalorder %s843_s18, 3 }
   0xc   : > { %p914_p6 = por %p117_p3, %p45_p0  ;;  %s845_s24 = smov [#allocation5]  }
   0xd   : > { %s1156_s21 = scalar_select %p909_p4, 1, 0 }
   0xe   : > { %s1157_s22 = scalar_select %p914_p6, 1, 0 }
   0xf   : > { %p919_p8 = pnand %p529_p5, %p150_p7  ;;  %s162_s25 = sshll.u32 %s845_s24, 4  ;;  %s923_s25 = int_to_ptr.vmem [resolvable:$true] %s162_s25 }
  0x10   : > { %s846_s27 = smov [#allocation7]   ;;  %s655_s5 = scalar_lea.hbm %s1149_s1, 192 }
  0x11   : > { %p589_p9 = pneg %p919_p8  ;;  %s175_s28 = sshll.u32 %s846_s27, 4  ;;  %s934_s28 = int_to_ptr.vmem [resolvable:$true] %s175_s28 }
  0x12   : > { %p656_p12 = scmp.ne.s32.totalorder %s1149_s1, %s655_s5  ;;  %p662_p5 = scmp.lt.u32.totalorder %s655_s5, %s1149_s1 }
  0x13   : > { %p930_p11 = pnand %p589_p9, %p1153_p1 }
  0x15   : > { %p657_p13 = pneg %p930_p11 }
  0x17   : > { %p658_p0 = pnand %p657_p13, %p656_p12 }
  0x19   : > { %p659_p3 = pneg %p658_p0 }
  0x1b   : > { %p664_p7 = pnand %p662_p5, %p659_p3 }
  0x1d   : > { %667 = shalt.err (!%p664_p7)
}
  0x1e   : > { %s668_s10 = scalar_lea.vmem %s923_s25, 192  ;;  %p676_p2 = scmp.lt.s32.totalorder %s923_s25, %s923_s25 }
  0x1f   : > { %p669_p9 = scmp.ne.s32.totalorder %s923_s25, %s668_s10  ;;  %p677_p12 = scmp.lt.s32.totalorder %s668_s10, %s668_s10 }
  0x21   : > { %p671_p10 = pnand %p669_p9, %p657_p13  ;;  %p678_p0 = por %p677_p12, %p676_p2 }
  0x23   : > { %p672_p1 = pneg %p671_p10 }
  0x25   : > { %p679_p6 = pnand %p678_p0, %p672_p1 }
  0x27   : > { %682 = shalt.err (!%p679_p6)
}
  0x28   : > { %s847_s11 = smov 64   ;;  %s848_s12 = smov 4  }
  0x29   : > { %592 = dma.hbm_to_vmem [thread:$0]  (!%p930_p11), %s1149_s1, 192, %s923_s25, [#allocation6], %s847_s11, %s847_s11, %s848_s12  }
  0x2a   : > { %s683_s27 = scalar_lea.hbm %s1150_s2, 192 }
  0x2b   : > { %p684_p2 = scmp.ne.s32.totalorder %s1150_s2, %s683_s27  ;;  %p690_p10 = scmp.lt.u32.totalorder %s683_s27, %s1150_s2 }
  0x2d   : > { %p686_p1 = pnand %p684_p2, %p657_p13 }
  0x2f   : > { %p687_p6 = pneg %p686_p1 }
  0x31   : > { %p692_p3 = pnand %p690_p10, %p687_p6 }
  0x33   : > { %695 = shalt.err (!%p692_p3)
}
  0x34   : > { %s696_s25 = scalar_lea.vmem %s934_s28, 192  ;;  %p704_p12 = scmp.lt.s32.totalorder %s934_s28, %s934_s28 }
  0x35   : > { %p697_p5 = scmp.ne.s32.totalorder %s934_s28, %s696_s25  ;;  %p705_p0 = scmp.lt.s32.totalorder %s696_s25, %s696_s25 }
  0x37   : > { %p699_p7 = pnand %p697_p5, %p657_p13  ;;  %p706_p2 = por %p705_p0, %p704_p12 }
  0x39   : > { %p700_p9 = pneg %p699_p7 }
  0x3b   : > { %p707_p1 = pnand %p706_p2, %p700_p9 }
  0x3d   : > { %710 = shalt.err (!%p707_p1)
}
  0x3e   : > { %595 = dma.hbm_to_vmem [thread:$0]  (!%p930_p11), %s1150_s2, 192, %s934_s28, [#allocation6], %s847_s11, %s847_s11, %s848_s12  }
  0x3f   : > { %s989_s9 = sadd.s32 1, %s843_s18   ;;  %s32_s26 = sadd.s32 1, %s839_s17 }
  0x40   : > { %s29_s10 = ssub.s32 %s843_s18, %s989_s9  ;;  %p39_p13 = scmp.ne.s32.totalorder %s839_s17, %s835_s16 }
  0x41   : > { %p30_p6 = scmp.eq.s32.totalorder %s29_s10, 0  ;;  %p40_p10 = scmp.eq.s32.totalorder %s843_s18, 0 }
  0x42   : > { %p1160_p3 = scmp.eq.s32.totalorder %s900_s19, 1  ;;  %p609_p7 = scmp.lt.s32.totalorder %s843_s18, 2 }
  0x43   : > { %s1005_s14 = scalar_select %p30_p6, %s839_s17, %s32_s26  }
  0x44   : > { %p999_p5 = por %p1160_p3, %p39_p13  ;;  %p41_p9 = por %p40_p10, %p39_p13 }
  0x45   : > { %s189_s20 = sand.u32 1, %s839_s17   ;;  %s534_s28 = sshll.u32 %s843_s18, 6 }
  0x46   : > { %s1161_s13 = scalar_select %p999_p5, 1, 0 }
  0x47   : > { %s533_s24 = sshll.u32 %s189_s20, 2  ;;  %s1012_s27 = scalar_lea.hbm %s1148_s0, %s534_s28 }
  0x48   : > { %s193_s29 = scalar_lea.vmem [#allocation2], %s533_s24  ;;  %p1016_p11 = pnand %p609_p7, %p41_p9 }
  0x49   : > { %s200_s30 = sshll.u32 %s193_s29, 4  ;;  %s190_s6 = scalar_lea.sflag [#allocation3], %s189_s20  ;;  %s1014_s30 = int_to_ptr.vmem [resolvable:$true] %s200_s30 }
  0x4a   : > { %s711_s25 = scalar_lea.hbm %s1012_s27, 64  ;;  %p713_p0 = pneg %p1016_p11 }
  0x4b   : > { %p712_p12 = scmp.ne.s32.totalorder %s1012_s27, %s711_s25  ;;  %s716_s26 = scalar_lea.hbm %s1148_s0, 128 }
  0x4c   : > { %p717_p13 = scmp.lt.u32.totalorder %s1012_s27, %s1148_s0  ;;  %p718_p6 = scmp.lt.u32.totalorder %s716_s26, %s711_s25 }
  0x4d   : > { %p714_p2 = pnand %p713_p0, %p712_p12  ;;  %p720_p3 = scmp.lt.u32.totalorder %s711_s25, %s1012_s27 }
  0x4e   : > { %p719_p10 = por %p718_p6, %p717_p13 }
  0x4f   : > { %p715_p1 = pneg %p714_p2 }
  0x50   : > { %p721_p7 = por %p720_p3, %p719_p10 }
  0x52   : > { %p722_p9 = pnand %p721_p7, %p715_p1 }
  0x54   : > { %725 = shalt.err (!%p722_p9)
}
  0x55   : > { %s726_s20 = scalar_lea.vmem %s1014_s30, 64  ;;  %s849_s28 = smov [#allocation2]  }
  0x56   : > { %p727_p12 = scmp.ne.s32.totalorder %s1014_s30, %s726_s20  ;;  %s731_s11 = sshll.u32 %s849_s28, 4  ;;  %s732_s11 = int_to_ptr.vmem [resolvable:$false] %s731_s11 }
  0x57   : > { %s733_s12 = scalar_lea.vmem %s732_s11, 128  ;;  %p734_p4 = scmp.lt.s32.totalorder %s1014_s30, %s732_s11 }
  0x58   : > { %p729_p2 = pnand %p727_p12, %p713_p0  ;;  %p735_p13 = scmp.lt.s32.totalorder %s733_s12, %s726_s20 }
  0x5a   : > { %p730_p5 = pneg %p729_p2  ;;  %p736_p6 = por %p735_p13, %p734_p4 }
  0x5c   : > { %p737_p10 = pnand %p736_p6, %p730_p5 }
  0x5e   : > { %740 = shalt.err (!%p737_p10)
}
  0x5f   : > { %599 = dma.hbm_to_vmem [thread:$0]  (!%p1016_p11), %s1012_s27, 64, %s1014_s30, %s190_s6  }
  0x60   : > { %209 = sbr.rel (%p919_p8) target bundleno = 368 (0x170), region = 32  ;;  %s1048_s29 = sand.u32 (!%p919_p8), 1, %s835_s16  }
  0x61   : > { %s1051_s25 = sshll.u32 (!%p919_p8), %s1048_s29, 2  ;;  %s212_s7 = scalar_lea.sflag (!%p919_p8), [#allocation3], %s1048_s29 }
  0x62   : > { %s215_s8 = scalar_lea.vmem (!%p919_p8), [#allocation2], %s1051_s25  ;;  %p1163_p4 = scmp.ne.s32.totalorder (!%p919_p8), %s1156_s21, 0 }
  0x67   : > { %814 = dma.done.wait (%p1163_p4), %s212_s7, 64  }
  0x68   : > { %816 = vsyncadd (%p1163_p4), %s212_s7, 4294967232  ;;  %p1164_p5 = scmp.eq.s32.totalorder %s900_s19, 0 }
  0x6a   : > { %818 = dma.done.wait (%p1164_p5), [#allocation6], 384   ;;  %p1165_p8 = pmov %p1164_p5 }
  0x6b   : > { %v850_v0 = vmov 0.0   ;;  %vm851_vm0 = vmmov 0   ;;  %v651_v1 = vld [vmem:[#allocation5] sm:$0xff]   ;;  %v652_v2 = vld [vmem:[#allocation7] sm:$0xff]   ;;  %vm271_vm1 = vcmask 1043456   ;;  %vm267_vm2 = vcmask 195584  }
  0x6c   : > { %820 = vsyncadd (%p1165_p8), [#allocation6], 4294966912  ;;  %559 = vmatprep.subr.bf16.mxu0 %v850_v0  ;;  %567 = vmatprep.subr.bf16.mxu1 %v850_v0  ;;  %v653_v3 = vld [vmem:[#allocation5 + $0x8] ss:$0 sps:$4 sm:$0xff]   ;;  %v654_v4 = vld [vmem:[#allocation7 + $0x8] ss:$0 sps:$4 sm:$0xff]  }
  0x6d   : > { %563 = vmatprep.mubr.msk.bf16.mxu0 %vm851_vm0, %v850_v0  ;;  %571 = vmatprep.mubr.msk.bf16.mxu1 %vm851_vm0, %v850_v0  ;;  %v273_v5 = vsel %vm271_vm1, %v653_v3, 0  ;;  %v331_v6 = vsel %vm271_vm1, %v654_v4, 0  ;;  %v254_v7 = vld [vmem:[%s215_s8] sm:$0xf]  ;;  %s549_s21 = sshll.u32 %s900_s19, 6  ;;  %s245_s23 = scalar_lea.vmem [#allocation8], %s1051_s25 }
  0x6e   : > { %560 = vmatpush3.bf16.msra.mxu0 %v651_v1  ;;  %568 = vmatpush3.bf16.msra.mxu1 %v652_v2  ;;  %s394_s27 = sshll.u32 %s245_s23, 4  ;;  %s252_s30 = scalar_lea.vmem [#allocation9], %s1051_s25  ;;  %vm316_vm3 = vcmask 257024   ;;  %s1073_s27 = int_to_ptr.vmem [resolvable:$true] %s394_s27 }
  0x6f   : > { %561 = vmatprep.subr.bf16.mxu0 %v850_v0  ;;  %569 = vmatprep.subr.bf16.mxu1 %v850_v0  ;;  %s407_s5 = sshll.u32 %s252_s30, 4  ;;  %s1071_s10 = scalar_lea.hbm %s1151_s3, %s549_s21  ;;  %s1080_s5 = int_to_ptr.vmem [resolvable:$true] %s407_s5 }
  0x70   : > { %s1078_s20 = scalar_lea.hbm %s1152_s4, %s549_s21  ;;  %s376_s28 = scalar_lea.sflag [#allocation4], %s1048_s29 }
  0x71   : > { %s741_s11 = scalar_lea.vmem %s1073_s27, 64  ;;  %p1166_p0 = scmp.ne.s32.totalorder %s1161_s13, 0 }
  0x72   : > { %562 = vmatpush3.bf16.msra.mxu0 %v273_v5  ;;  %570 = vmatpush3.bf16.msra.mxu1 %v331_v6  ;;  %p742_p11 = scmp.ne.s32.totalorder %s1073_s27, %s741_s11  ;;  %s852_s12 = smov [#allocation8]  }
  0x73   : > { %s745_s7 = sshll.u32 %s852_s12, 4  ;;  %s746_s7 = int_to_ptr.vmem [resolvable:$false] %s745_s7 }
  0x74   : > { %p743_p1 = pnand %p742_p11, %p1166_p0  ;;  %s747_s8 = scalar_lea.vmem %s746_s7, 128 }
  0x75   : > { %564 = vmatmul.mubr.msk.bf16.vlgmr.msra.gmra.mrb[0].mxu0 %vm267_vm2, %v254_v7  ;;  %572 = vmatmul.mubr.msk.bf16.vlgmr.msra.gmra.mrb[0].mxu1 %vm267_vm2, %v254_v7  ;;  %p748_p7 = scmp.lt.s32.totalorder %s1073_s27, %s746_s7  ;;  %p749_p9 = scmp.lt.s32.totalorder %s747_s8, %s741_s11 }
  0x76   : > { %p744_p3 = pneg %p743_p1 }
  0x77   : > { %p750_p12 = por %p749_p9, %p748_p7 }
  0x79   : > { %p751_p2 = pnand %p750_p12, %p744_p3 }
 0x148   : > { %v309_v8 = vpop.f32.mrb[0].mxu0  ;;  %v367_v10 = vpop.f32.mrb[0].mxu1 }
 0x149   : > { %v315_v9 = vpack.c.bf16 %v309_v8, %v309_v8  ;;  %v565_v11 = vpop.f32.mrb[1].mxu0  ;;  %v373_v12 = vpack.c.bf16 %v367_v10, %v367_v10  ;;  %v573_v13 = vpop.f32.mrb[1].mxu1 }
 0x14a   : > { %v312_v14 = vpop.f32.mrb[2].mxu0  ;;  %v370_v15 = vpop.f32.mrb[2].mxu1 }
 0x14b   : > { %v566_v16 = vpop.f32.mrb[3].mxu0  ;;  %317 = vst.msk [vmem:[%s245_s23] sm:$0xf] %vm316_vm3, %v315_v9  ;;  %v574_v17 = vpop.f32.mrb[3].mxu1 }
 0x14c   : > { %754 = shalt.err (!%p751_p2)
}
 0x14d   : > { %s755_s21 = scalar_lea.hbm %s1071_s10, 64  ;;  %s759_s26 = scalar_lea.hbm %s1151_s3, 128 }
 0x14e   : > { %p756_p13 = scmp.ne.s32.totalorder %s1071_s10, %s755_s21  ;;  %p760_p4 = scmp.lt.u32.totalorder %s1071_s10, %s1151_s3 }
 0x14f   : > { %p761_p5 = scmp.lt.u32.totalorder %s759_s26, %s755_s21  ;;  %p763_p11 = scmp.lt.u32.totalorder %s755_s21, %s1071_s10 }
 0x150   : > { %p757_p6 = pnand %p756_p13, %p1166_p0 }
 0x151   : > { %p762_p8 = por %p761_p5, %p760_p4 }
 0x152   : > { %p758_p10 = pneg %p757_p6 }
 0x153   : > { %p764_p1 = por %p763_p11, %p762_p8 }
 0x155   : > { %p765_p3 = pnand %p764_p1, %p758_p10 }
 0x157   : > { %768 = shalt.err (!%p765_p3)
}
 0x158   : > { %585 = dma.vmem_to_hbm [thread:$0]  (%p1166_p0), %s1073_s27, 64, %s1071_s10, %s376_s28   ;;  %374 = vst.msk [vmem:[%s252_s30] sm:$0xf] %vm316_vm3, %v373_v12 }
 0x159   : > { %s381_s11 = scalar_lea.sflag [#allocation10], %s1048_s29  ;;  %s769_s12 = scalar_lea.vmem %s1080_s5, 64 }
 0x15a   : > { %p770_p7 = scmp.ne.s32.totalorder %s1080_s5, %s769_s12  ;;  %s853_s7 = smov [#allocation9]  }
 0x15b   : > { %s773_s8 = sshll.u32 %s853_s7, 4  ;;  %s774_s8 = int_to_ptr.vmem [resolvable:$false] %s773_s8 }
 0x15c   : > { %p771_p9 = pnand %p770_p7, %p1166_p0  ;;  %s775_s21 = scalar_lea.vmem %s774_s8, 128 }
 0x15d   : > { %p776_p2 = scmp.lt.s32.totalorder %s1080_s5, %s774_s8  ;;  %p777_p13 = scmp.lt.s32.totalorder %s775_s21, %s769_s12 }
 0x15e   : > { %p772_p12 = pneg %p771_p9 }
 0x15f   : > { %p778_p6 = por %p777_p13, %p776_p2 }
 0x161   : > { %p779_p10 = pnand %p778_p6, %p772_p12 }
 0x163   : > { %782 = shalt.err (!%p779_p10)
}
 0x164   : > { %s783_s29 = scalar_lea.hbm %s1078_s20, 64  ;;  %s787_s30 = scalar_lea.hbm %s1152_s4, 128 }
 0x165   : > { %p784_p4 = scmp.ne.s32.totalorder %s1078_s20, %s783_s29  ;;  %p788_p11 = scmp.lt.u32.totalorder %s1078_s20, %s1152_s4 }
 0x166   : > { %p789_p1 = scmp.lt.u32.totalorder %s787_s30, %s783_s29  ;;  %p791_p7 = scmp.lt.u32.totalorder %s783_s29, %s1078_s20 }
 0x167   : > { %p785_p5 = pnand %p784_p4, %p1166_p0 }
 0x168   : > { %p790_p3 = por %p789_p1, %p788_p11 }
 0x169   : > { %p786_p8 = pneg %p785_p5 }
 0x16a   : > { %p792_p9 = por %p791_p7, %p790_p3 }
 0x16c   : > { %p793_p12 = pnand %p792_p9, %p786_p8 }
 0x16e   : > { %796 = shalt.err (!%p793_p12)
}
 0x16f   : > { %586 = dma.vmem_to_hbm [thread:$0]  (%p1166_p0), %s1080_s5, 64, %s1078_s20, %s381_s11  }
 0x170 PF: > { %s419_s23 = sand.u32 1, %s831_s15   ;;  %p1167_p2 = scmp.ne.s32.totalorder %s1157_s22, 0 }
 0x171   : > { %p1168_p13 = scmp.ge.s32.totalorder %s843_s18, 2  ;;  %s420_s6 = scalar_lea.sflag [#allocation4], %s419_s23 }
 0x173   : > { %p601_p6 = pnand %p1168_p13, %p1167_p2 }
 0x175   : > { %822 = dma.done.wait (!%p601_p6), %s420_s6, 64  }
 0x176   : > { %824 = vsyncadd (!%p601_p6), %s420_s6, 4294967232  ;;  %s429_s26 = scalar_lea.sflag [#allocation10], %s419_s23 }
 0x177   : > { %826 = dma.done.wait (!%p601_p6), %s429_s26, 64  }
 0x178   : > { %828 = vsyncadd (!%p601_p6), %s429_s26, 4294967232  ;;  %p22_p0 = scmp.ge.s32.totalorder %s989_s9, 4   ;;  %s1169_s15 = smov %s835_s16 }
 0x179   : > { %s1170_s16 = smov %s839_s17  ;;  %s1171_s17 = smov %s1005_s14 }
 0x17a   : > { %s1172_s18 = smov %s989_s9  ;;  %24 = sbr.rel (!%p22_p0) target bundleno = 8 (0x8), region = 102 }
 0x181   :  { %434 = vsyncpa [#allocation3], 1 }
 0x182   :  { %436 = vsyncpa [#allocation3 + $0x1], 1 }
 0x183   :  { %437 = vsyncpa [#allocation6], 1 }
 0x184   :  { %438 = vsyncpa [#allocation4], 1 }
 0x185   :  { %440 = vsyncpa [#allocation4 + $0x1], 1 }
 0x186   :  { %441 = vsyncpa [#allocation10], 1 }
 0x187   :  { %443 = vsyncpa [#allocation10 + $0x1], 1 }

</bundles_post_ra>
